<compile_context>
chip_gen: v6e
topology: v6e:2x2x1
jax: 0.10.0
libtpu: 0.0.40
codegen_flags: <defaults>
</compile_context>

<pallas_src>
import functools

import jax
import jax.numpy as jnp
from jax.experimental import pallas as pl
from jax.experimental.pallas import tpu as pltpu

LN_EPS = 1e-5  # torch.nn.LayerNorm default

# Packed parameter row layout (rows of the (16, D) parameter block):
#   0..5 : Linear(6, D) weight rows (x1, y1, x2, y2, w, h)
#   6    : Linear bias
#   7, 8 : bbox_ln gamma, beta
#   9,10 : add_ln  gamma, beta
#  11..15: zero padding (sublane alignment)


def _layernorm(x, gamma, beta):
    mu = jnp.mean(x, axis=-1, keepdims=True)
    xc = x - mu
    var = jnp.mean(xc * xc, axis=-1, keepdims=True)
    return xc * jax.lax.rsqrt(var + LN_EPS) * gamma + beta


def posfeat_kernel(box_ref, size_ref, feat_ref, p_ref, out_ref):
    box = box_ref[...]                          # (tm, 4) f32
    size = size_ref[...]                        # (tm, 2) f32  [H, W]
    feat = feat_ref[...].astype(jnp.float32)    # (tm, D)
    p = p_ref[...]                              # (16, D) f32 packed params

    inv_h = 1.0 / size[:, 0:1]
    inv_w = 1.0 / size[:, 1:2]
    x1 = box[:, 0:1] * inv_w
    y1 = box[:, 1:2] * inv_h
    x2 = box[:, 2:3] * inv_w
    y2 = box[:, 3:4] * inv_h
    bw = (box[:, 2:3] - box[:, 0:1]) * inv_w
    bh = (box[:, 3:4] - box[:, 1:2]) * inv_h

    # Linear(6, D): K=6 is far too small for the MXU; six broadcast-FMAs on the VPU
    # avoid the lane-sparse (tm, 6) concat entirely.
    proj = (x1 * p[0:1, :] + y1 * p[1:2, :] + x2 * p[2:3, :]
            + y2 * p[3:4, :] + bw * p[4:5, :] + bh * p[5:6, :] + p[6:7, :])

    proj = _layernorm(proj, p[7:8, :], p[8:9, :])          # bbox_ln
    y = feat + proj
    out_ref[...] = _layernorm(y, p[9:10, :], p[10:11, :]).astype(out_ref.dtype)  # add_ln


def _choose_tm(M, D, feat_itemsize, out_itemsize):
    """Largest row tile (multiple of 8) whose double-buffered tiles fit a conservative
    VMEM budget (safe even for v7x's smaller scoped-VMEM default)."""
    m_pad8 = max(8, ((M + 7) // 8) * 8)
    vmem_budget = 12 * 1024 * 1024
    per_row = 2 * (D * feat_itemsize + D * out_itemsize + 4 * 4 + 2 * 4)  # 2x = double buffer
    tm = int(vmem_budget // per_row)
    tm = min(tm, 2048, m_pad8)
    tm = max(8, tm - (tm % 8))
    # Keep at least 2 grid steps so the grid can shard across v7x's 2 TensorCores.
    if tm >= m_pad8 and m_pad8 >= 16:
        half = m_pad8 // 2
        tm = max(8, half - (half % 8))
    return tm


@jax.jit
def pos_feat_appender(feats, lines_box, img_sizes, params):
    """feats: (B,N,D), lines_box: (B,N,4), img_sizes: (B,N,2) with [H,W].

    Returns the updated feats as a single (B, N, D) array (same dtype as `feats`);
    slice per-batch at the caller for parity with the PyTorch `list(feats)` return.
    """
    B, N, D = feats.shape
    M = B * N
    out_dtype = feats.dtype

    tm = _choose_tm(M, D, feats.dtype.itemsize, jnp.dtype(out_dtype).itemsize)
    m_pad = pl.cdiv(M, tm) * tm

    feats2 = feats.reshape(M, D)                               # keep HBM dtype
    boxes = lines_box.reshape(M, 4).astype(jnp.float32)        # tiny vs feats
    sizes = img_sizes.reshape(M, 2).astype(jnp.float32)

    if m_pad != M:
        pad = m_pad - M
        feats2 = jnp.pad(feats2, ((0, pad), (0, 0)))
        boxes = jnp.pad(boxes, ((0, pad), (0, 0)))
        sizes = jnp.pad(sizes, ((0, pad), (0, 0)), constant_values=1.0)  # avoid 1/0

    # Pack all per-feature parameters into one (16, D) f32 block.
    pack = jnp.concatenate([
        params["w"].astype(jnp.float32).reshape(6, D),
        params["b"].astype(jnp.float32).reshape(1, D),
        params["g_bbox"].astype(jnp.float32).reshape(1, D),
        params["b_bbox"].astype(jnp.float32).reshape(1, D),
        params["g_add"].astype(jnp.float32).reshape(1, D),
        params["b_add"].astype(jnp.float32).reshape(1, D),
        jnp.zeros((5, D), jnp.float32),
    ], axis=0)  # (16, D)

    row_spec = lambda cols: pl.BlockSpec((tm, cols), lambda i: (i, 0))

    out = pl.pallas_call(
        posfeat_kernel,
        out_shape=jax.ShapeDtypeStruct((m_pad, D), out_dtype),
        grid=(m_pad // tm,),
        in_specs=[
            row_spec(4),                                # boxes
            row_spec(2),                                # sizes [H, W]
            row_spec(D),                                # feats
            pl.BlockSpec((16, D), lambda i: (0, 0)),    # packed params (resident)
        ],
        out_specs=pl.BlockSpec((tm, D), lambda i: (i, 0)),
        compiler_params=pltpu.CompilerParams(
            dimension_semantics=("parallel",)),
    )(boxes, sizes, feats2, pack)

    return out[:M].reshape(B, N, D)


def reference(feats, lines_box, img_sizes, params):
    """Pure-JAX reference mirroring the PyTorch forward."""
    def ln(x, g, b):
        mu = jnp.mean(x, axis=-1, keepdims=True)
        var = jnp.mean((x - mu) ** 2, axis=-1, keepdims=True)
        return (x - mu) / jnp.sqrt(var + LN_EPS) * g + b

    outs = []
    for idx in range(feats.shape[0]):
        lb = lines_box[idx]
        sz = img_sizes[idx]
        x1 = lb[:, 0] / sz[:, 1]
        y1 = lb[:, 1] / sz[:, 0]
        x2 = lb[:, 2] / sz[:, 1]
        y2 = lb[:, 3] / sz[:, 0]
        w = (lb[:, 2] - lb[:, 0]) / sz[:, 1]
        h = (lb[:, 3] - lb[:, 1]) / sz[:, 0]
        inp = jnp.stack((x1, y1, x2, y2, w, h), axis=-1)
        proj = inp @ params["w"] + params["b"]
        proj = ln(proj, params["g_bbox"], params["b_bbox"])
        outs.append(ln(feats[idx] + proj, params["g_add"], params["b_add"]))
    return outs


if __name__ == "__main__":
    key = jax.random.PRNGKey(0)
    B, N, D = 2, 8, 32   # batch, lines-per-image, output_dim

    k1, k2, k3, k4, k5 = jax.random.split(key, 5)

    # Deterministic synthetic parameters (shapes from __init__).
    params = {
        "w": jax.random.normal(k1, (6, D), jnp.float32) * 0.1,   # Linear(6, D) weight (in, out)
        "b": jax.random.normal(k2, (D,), jnp.float32) * 0.01,    # Linear bias
        "g_bbox": jnp.ones((D,), jnp.float32),                   # bbox_ln weight
        "b_bbox": jnp.zeros((D,), jnp.float32),                  # bbox_ln bias
        "g_add": jnp.ones((D,), jnp.float32),                    # add_ln weight
        "b_add": jnp.zeros((D,), jnp.float32),                   # add_ln bias
    }

    feats = jax.random.normal(k3, (B, N, D), jnp.float32)

    # Boxes: x1 < x2, y1 < y2 inside a 640x480-ish image.
    xy1 = jax.random.uniform(k4, (B, N, 2), jnp.float32, 10.0, 200.0)
    wh = jax.random.uniform(k5, (B, N, 2), jnp.float32, 5.0, 100.0)
    lines_box = jnp.concatenate([xy1, xy1 + wh], axis=-1)        # (B, N, 4)

    # Per-line image size [H, W] (constant per image, broadcast per line).
    img_sizes = jnp.broadcast_to(
        jnp.array([[480.0, 640.0], [512.0, 768.0]], jnp.float32)[:, None, :],
        (B, N, 2))

    out_arr = jax.block_until_ready(
        pos_feat_appender(feats, lines_box, img_sizes, params))

    # PyTorch forward returns list(feats): slice lazily for per-batch parity check.
    out_list = [out_arr[i] for i in range(B)]
    ref_list = reference(feats, lines_box, img_sizes, params)
    for o, r in zip(out_list, ref_list):
        assert jnp.allclose(o, r, rtol=1e-4, atol=1e-4), "mismatch vs reference"

    print("KERNEL_OK")
</pallas_src>

<mosaic_0001>
module attributes {stable_mosaic.version = 11 : i64} {
  func.func @posfeat_kernel(%arg0: i32, %arg1: memref<8x4xf32, #tpu.memory_space<vmem>>, %arg2: memref<8x2xf32, #tpu.memory_space<vmem>>, %arg3: memref<8x32xf32, #tpu.memory_space<vmem>>, %arg4: memref<16x32xf32, #tpu.memory_space<vmem>>, %arg5: memref<8x32xf32, #tpu.memory_space<vmem>>) attributes {dimension_semantics = [#tpu.dimension_semantics<parallel>], iteration_bounds = array<i64: 2>, scalar_prefetch = 0 : i64, scratch_operands = 0 : i64, tpu.core_type = #tpu.core_type<tc>, window_params = [{transform_indices = @transform_0, window_bounds = array<i64: 8, 4>}, {transform_indices = @transform_1, window_bounds = array<i64: 8, 2>}, {transform_indices = @transform_2, window_bounds = array<i64: 8, 32>}, {pipeline_mode = #tpu.pipeline_mode<synchronous>, transform_indices = @transform_3, window_bounds = array<i64: 16, 32>}, {transform_indices = @transform_4, window_bounds = array<i64: 8, 32>}]} {
    %c0 = arith.constant 0 : index
    %c0_0 = arith.constant 0 : index
    %0 = vector.load %arg1[%c0, %c0_0] : memref<8x4xf32, #tpu.memory_space<vmem>>, vector<8x4xf32>
    %c0_1 = arith.constant 0 : index
    %c0_2 = arith.constant 0 : index
    %1 = vector.load %arg2[%c0_1, %c0_2] : memref<8x2xf32, #tpu.memory_space<vmem>>, vector<8x2xf32>
    %c0_3 = arith.constant 0 : index
    %c0_4 = arith.constant 0 : index
    %2 = vector.load %arg3[%c0_3, %c0_4] : memref<8x32xf32, #tpu.memory_space<vmem>>, vector<8x32xf32>
    %c0_5 = arith.constant 0 : index
    %c0_6 = arith.constant 0 : index
    %3 = vector.load %arg4[%c0_5, %c0_6] : memref<16x32xf32, #tpu.memory_space<vmem>>, vector<16x32xf32>
    %4 = vector.extract_strided_slice %1 {offsets = [0, 0], sizes = [8, 1], strides = [1, 1]} : vector<8x2xf32> to vector<8x1xf32>
    %cst = arith.constant 1.000000e+00 : f32
    %5 = vector.broadcast %cst : f32 to vector<8x1xf32>
    %6 = arith.divf %5, %4 : vector<8x1xf32>
    %7 = vector.extract_strided_slice %1 {offsets = [0, 1], sizes = [8, 1], strides = [1, 1]} : vector<8x2xf32> to vector<8x1xf32>
    %cst_7 = arith.constant 1.000000e+00 : f32
    %8 = vector.broadcast %cst_7 : f32 to vector<8x1xf32>
    %9 = arith.divf %8, %7 : vector<8x1xf32>
    %10 = vector.extract_strided_slice %0 {offsets = [0, 0], sizes = [8, 1], strides = [1, 1]} : vector<8x4xf32> to vector<8x1xf32>
    %11 = arith.mulf %10, %9 : vector<8x1xf32>
    %12 = vector.extract_strided_slice %0 {offsets = [0, 1], sizes = [8, 1], strides = [1, 1]} : vector<8x4xf32> to vector<8x1xf32>
    %13 = arith.mulf %12, %6 : vector<8x1xf32>
    %14 = vector.extract_strided_slice %0 {offsets = [0, 2], sizes = [8, 1], strides = [1, 1]} : vector<8x4xf32> to vector<8x1xf32>
    %15 = arith.mulf %14, %9 : vector<8x1xf32>
    %16 = vector.extract_strided_slice %0 {offsets = [0, 3], sizes = [8, 1], strides = [1, 1]} : vector<8x4xf32> to vector<8x1xf32>
    %17 = arith.mulf %16, %6 : vector<8x1xf32>
    %18 = vector.extract_strided_slice %0 {offsets = [0, 2], sizes = [8, 1], strides = [1, 1]} : vector<8x4xf32> to vector<8x1xf32>
    %19 = vector.extract_strided_slice %0 {offsets = [0, 0], sizes = [8, 1], strides = [1, 1]} : vector<8x4xf32> to vector<8x1xf32>
    %20 = arith.subf %18, %19 : vector<8x1xf32>
    %21 = arith.mulf %20, %9 : vector<8x1xf32>
    %22 = vector.extract_strided_slice %0 {offsets = [0, 3], sizes = [8, 1], strides = [1, 1]} : vector<8x4xf32> to vector<8x1xf32>
    %23 = vector.extract_strided_slice %0 {offsets = [0, 1], sizes = [8, 1], strides = [1, 1]} : vector<8x4xf32> to vector<8x1xf32>
    %24 = arith.subf %22, %23 : vector<8x1xf32>
    %25 = arith.mulf %24, %6 : vector<8x1xf32>
    %26 = vector.extract_strided_slice %3 {offsets = [0, 0], sizes = [1, 32], strides = [1, 1]} : vector<16x32xf32> to vector<1x32xf32>
    %27 = vector.broadcast %11 : vector<8x1xf32> to vector<8x32xf32>
    %28 = vector.broadcast %26 : vector<1x32xf32> to vector<8x32xf32>
    %29 = arith.mulf %27, %28 : vector<8x32xf32>
    %30 = vector.extract_strided_slice %3 {offsets = [1, 0], sizes = [1, 32], strides = [1, 1]} : vector<16x32xf32> to vector<1x32xf32>
    %31 = vector.broadcast %13 : vector<8x1xf32> to vector<8x32xf32>
    %32 = vector.broadcast %30 : vector<1x32xf32> to vector<8x32xf32>
    %33 = arith.mulf %31, %32 : vector<8x32xf32>
    %34 = arith.addf %29, %33 : vector<8x32xf32>
    %35 = vector.extract_strided_slice %3 {offsets = [2, 0], sizes = [1, 32], strides = [1, 1]} : vector<16x32xf32> to vector<1x32xf32>
    %36 = vector.broadcast %15 : vector<8x1xf32> to vector<8x32xf32>
    %37 = vector.broadcast %35 : vector<1x32xf32> to vector<8x32xf32>
    %38 = arith.mulf %36, %37 : vector<8x32xf32>
    %39 = arith.addf %34, %38 : vector<8x32xf32>
    %40 = vector.extract_strided_slice %3 {offsets = [3, 0], sizes = [1, 32], strides = [1, 1]} : vector<16x32xf32> to vector<1x32xf32>
    %41 = vector.broadcast %17 : vector<8x1xf32> to vector<8x32xf32>
    %42 = vector.broadcast %40 : vector<1x32xf32> to vector<8x32xf32>
    %43 = arith.mulf %41, %42 : vector<8x32xf32>
    %44 = arith.addf %39, %43 : vector<8x32xf32>
    %45 = vector.extract_strided_slice %3 {offsets = [4, 0], sizes = [1, 32], strides = [1, 1]} : vector<16x32xf32> to vector<1x32xf32>
    %46 = vector.broadcast %21 : vector<8x1xf32> to vector<8x32xf32>
    %47 = vector.broadcast %45 : vector<1x32xf32> to vector<8x32xf32>
    %48 = arith.mulf %46, %47 : vector<8x32xf32>
    %49 = arith.addf %44, %48 : vector<8x32xf32>
    %50 = vector.extract_strided_slice %3 {offsets = [5, 0], sizes = [1, 32], strides = [1, 1]} : vector<16x32xf32> to vector<1x32xf32>
    %51 = vector.broadcast %25 : vector<8x1xf32> to vector<8x32xf32>
    %52 = vector.broadcast %50 : vector<1x32xf32> to vector<8x32xf32>
    %53 = arith.mulf %51, %52 : vector<8x32xf32>
    %54 = arith.addf %49, %53 : vector<8x32xf32>
    %55 = vector.extract_strided_slice %3 {offsets = [6, 0], sizes = [1, 32], strides = [1, 1]} : vector<16x32xf32> to vector<1x32xf32>
    %56 = vector.broadcast %55 : vector<1x32xf32> to vector<8x32xf32>
    %57 = arith.addf %54, %56 : vector<8x32xf32>
    %58 = vector.extract_strided_slice %3 {offsets = [7, 0], sizes = [1, 32], strides = [1, 1]} : vector<16x32xf32> to vector<1x32xf32>
    %59 = vector.extract_strided_slice %3 {offsets = [8, 0], sizes = [1, 32], strides = [1, 1]} : vector<16x32xf32> to vector<1x32xf32>
    %cst_8 = arith.constant dense<0.000000e+00> : vector<8xf32>
    %60 = vector.multi_reduction <add>, %57, %cst_8 [1] : vector<8x32xf32> to vector<8xf32>
    %61 = vector.shape_cast %60 : vector<8xf32> to vector<8x1xf32>
    %cst_9 = arith.constant 3.200000e+01 : f32
    %62 = vector.broadcast %cst_9 : f32 to vector<8x1xf32>
    %63 = arith.divf %61, %62 : vector<8x1xf32>
    %64 = vector.broadcast %63 : vector<8x1xf32> to vector<8x32xf32>
    %65 = arith.subf %57, %64 : vector<8x32xf32>
    %66 = arith.mulf %65, %65 : vector<8x32xf32>
    %cst_10 = arith.constant dense<0.000000e+00> : vector<8xf32>
    %67 = vector.multi_reduction <add>, %66, %cst_10 [1] : vector<8x32xf32> to vector<8xf32>
    %68 = vector.shape_cast %67 : vector<8xf32> to vector<8x1xf32>
    %cst_11 = arith.constant 3.200000e+01 : f32
    %69 = vector.broadcast %cst_11 : f32 to vector<8x1xf32>
    %70 = arith.divf %68, %69 : vector<8x1xf32>
    %cst_12 = arith.constant 9.99999974E-6 : f32
    %71 = vector.broadcast %cst_12 : f32 to vector<8x1xf32>
    %72 = arith.addf %70, %71 : vector<8x1xf32>
    %73 = math.rsqrt %72 : vector<8x1xf32>
    %74 = vector.broadcast %73 : vector<8x1xf32> to vector<8x32xf32>
    %75 = arith.mulf %65, %74 : vector<8x32xf32>
    %76 = vector.broadcast %58 : vector<1x32xf32> to vector<8x32xf32>
    %77 = arith.mulf %75, %76 : vector<8x32xf32>
    %78 = vector.broadcast %59 : vector<1x32xf32> to vector<8x32xf32>
    %79 = arith.addf %77, %78 : vector<8x32xf32>
    %80 = arith.addf %2, %79 : vector<8x32xf32>
    %81 = vector.extract_strided_slice %3 {offsets = [9, 0], sizes = [1, 32], strides = [1, 1]} : vector<16x32xf32> to vector<1x32xf32>
    %82 = vector.extract_strided_slice %3 {offsets = [10, 0], sizes = [1, 32], strides = [1, 1]} : vector<16x32xf32> to vector<1x32xf32>
    %cst_13 = arith.constant dense<0.000000e+00> : vector<8xf32>
    %83 = vector.multi_reduction <add>, %80, %cst_13 [1] : vector<8x32xf32> to vector<8xf32>
    %84 = vector.shape_cast %83 : vector<8xf32> to vector<8x1xf32>
    %cst_14 = arith.constant 3.200000e+01 : f32
    %85 = vector.broadcast %cst_14 : f32 to vector<8x1xf32>
    %86 = arith.divf %84, %85 : vector<8x1xf32>
    %87 = vector.broadcast %86 : vector<8x1xf32> to vector<8x32xf32>
    %88 = arith.subf %80, %87 : vector<8x32xf32>
    %89 = arith.mulf %88, %88 : vector<8x32xf32>
    %cst_15 = arith.constant dense<0.000000e+00> : vector<8xf32>
    %90 = vector.multi_reduction <add>, %89, %cst_15 [1] : vector<8x32xf32> to vector<8xf32>
    %91 = vector.shape_cast %90 : vector<8xf32> to vector<8x1xf32>
    %cst_16 = arith.constant 3.200000e+01 : f32
    %92 = vector.broadcast %cst_16 : f32 to vector<8x1xf32>
    %93 = arith.divf %91, %92 : vector<8x1xf32>
    %cst_17 = arith.constant 9.99999974E-6 : f32
    %94 = vector.broadcast %cst_17 : f32 to vector<8x1xf32>
    %95 = arith.addf %93, %94 : vector<8x1xf32>
    %96 = math.rsqrt %95 : vector<8x1xf32>
    %97 = vector.broadcast %96 : vector<8x1xf32> to vector<8x32xf32>
    %98 = arith.mulf %88, %97 : vector<8x32xf32>
    %99 = vector.broadcast %81 : vector<1x32xf32> to vector<8x32xf32>
    %100 = arith.mulf %98, %99 : vector<8x32xf32>
    %101 = vector.broadcast %82 : vector<1x32xf32> to vector<8x32xf32>
    %102 = arith.addf %100, %101 : vector<8x32xf32>
    %c0_18 = arith.constant 0 : index
    %c0_19 = arith.constant 0 : index
    %103 = vector.load %arg5[%c0_18, %c0_19] : memref<8x32xf32, #tpu.memory_space<vmem>>, vector<8x32xf32>
    tpu.vector_store %arg5[%c0_18, %c0_19], %102 {strides = array<i32>} : memref<8x32xf32, #tpu.memory_space<vmem>>, vector<8x32xf32>,
    return
  }
  func.func @transform_0(%arg0: i32) -> (i32, i32) {
    %c0_i32 = arith.constant 0 : i32
    %c0_i32_0 = arith.constant 0 : i32
    return %arg0, %c0_i32 : i32, i32
  }
  func.func @transform_1(%arg0: i32) -> (i32, i32) {
    %c0_i32 = arith.constant 0 : i32
    %c0_i32_0 = arith.constant 0 : i32
    return %arg0, %c0_i32 : i32, i32
  }
  func.func @transform_2(%arg0: i32) -> (i32, i32) {
    %c0_i32 = arith.constant 0 : i32
    %c0_i32_0 = arith.constant 0 : i32
    return %arg0, %c0_i32 : i32, i32
  }
  func.func @transform_3(%arg0: i32) -> (i32, i32) {
    %c0_i32 = arith.constant 0 : i32
    %c0_i32_0 = arith.constant 0 : i32
    %c0_i32_1 = arith.constant 0 : i32
    return %c0_i32, %c0_i32_0 : i32, i32
  }
  func.func @transform_4(%arg0: i32) -> (i32, i32) {
    %c0_i32 = arith.constant 0 : i32
    %c0_i32_0 = arith.constant 0 : i32
    return %arg0, %c0_i32 : i32, i32
  }
}

</mosaic_0001>

<bundles_post_ra>
// kernel: pos_feat_appender.1
= control target key start
LH: loop header
LB: loop body
LE: loop exit
PB: predicated region body
PF: predicated region fallthrough
CT: control target
= control target key end

     0   :  { %9 = vsyncpa [#allocation3], 0  ;;  %s763_s0 = inlined_call_operand.vmem [shape: f32[16,4], index: 0, kind: input, shape index: {}]   ;;  %s764_s1 = inlined_call_operand.vmem [shape: f32[16,2], index: 1, kind: input, shape index: {}]   ;;  %s765_s2 = inlined_call_operand.vmem [shape: f32[16,32], index: 2, kind: input, shape index: {}]   ;;  %s766_s3 = inlined_call_operand.vmem [shape: f32[16,32], index: 3, kind: input, shape index: {}]   ;;  %s767_s4 = inlined_call_operand.hbm [shape: f32[16,32], index: 4, kind: output, shape index: {}]  }
   0x1   :  { %11 = vsyncpa [#allocation3 + $0x1], 0  ;;  %s636_s15 = smov 0   ;;  %s638_s16 = smov 0  }
   0x2   :  { %s640_s17 = smov 0   ;;  %s642_s18 = smov 0  }
   0x3 LB: > { %s657_s19 = sadd.s32 4294967295, %s600_s18   ;;  %s470_s20 = sadd.s32 4294967294, %s600_s18   ;;  %s600_s18 = sphi %s642_s18, %s773_s18   ;;  %s596_s17 = sphi %s640_s17, %s772_s17   ;;  %s592_s16 = sphi %s638_s16, %s771_s16   ;;  %s588_s15 = sphi %s636_s15, %s770_s15  }
   0x4   : > { %s661_s21 = sadd.s32 1, %s600_s18   ;;  %s123_s22 = sadd.s32 1, %s596_s17 }
   0x5   : > { %s120_s23 = ssub.s32 %s600_s18, %s661_s21  ;;  %p133_p0 = scmp.ne.s32.totalorder %s596_s17, %s592_s16 }
   0x6   : > { %p121_p1 = scmp.eq.s32.totalorder %s120_s23, 0  ;;  %p134_p2 = scmp.eq.s32.totalorder %s657_s19, 1 }
   0x7   : > { %p139_p3 = scmp.ne.s32.totalorder %s592_s16, %s588_s15  ;;  %p140_p4 = scmp.eq.s32.totalorder %s470_s20, 1 }
   0x8   : > { %s672_s24 = scalar_select %p121_p1, %s596_s17, %s123_s22  }
   0x9   : > { %p674_p5 = por %p134_p2, %p133_p0  ;;  %p678_p6 = por %p140_p4, %p139_p3 }
   0xa   : > { %p473_p7 = scmp.ge.s32.totalorder %s600_s18, 1  ;;  %p182_p8 = scmp.lt.s32.totalorder %s600_s18, 3 }
   0xc   : > { %p183_p9 = pnand %p473_p7, %p182_p8 }
   0xd   : > { %p215_p10 = scmp.lt.s32.totalorder (!%p183_p9), %s657_s19, 1  ;;  %s604_s9 = smov (!%p183_p9), 3  }
   0xe   : > { %186 = sbr.rel (%p183_p9) target bundleno = 934 (0x3a6), region = 36  ;;  %s605_s10 = smov (!%p183_p9), 127  }
   0xf   : > { %s606_s11 = smov (!%p183_p9), 1   ;;  %s607_s12 = smov (!%p183_p9), 2  }
  0x10   : > { %s610_s13 = smov (!%p183_p9), [#allocation2]  }
  0x11   : > { %s544_s14 = sshll.u32 (!%p183_p9), %s610_s13, 4  ;;  %s545_s14 = int_to_ptr.vmem [resolvable:$false] %s544_s14 }
  0x13   : > { %s216_s27 = scalar_select %p215_p10, %s657_s19, 1  ;;  %v602_v1 = vmov 0   ;;  %v603_v2 = vmov 1   ;;  %v608_v12 = vmov 3   ;;  %v609_v14 = vmov 2   ;;  %v230_v21 = vld [vmem:[%s766_s3] sm:$0xff] }
  0x14   : > { %529 = vset.pattern.permute.xlu0 %v602_v1  ;;  %530 = vset.pattern.permute.xlu1 %v603_v2  ;;  %v259_v17 = vlaneseq  ;;  %vm323_vm0 = vcmask 261120   ;;  %v231_v62 = vld [vmem:[%s766_s3 + $0x8] sm:$0xff] }
  0x15   : > { %s686_s28 = sshll.u32 %s216_s27, 3 }
  0x16   : > { %s222_s5 = scalar_lea.vmem %s764_s1, %s686_s28  ;;  %s218_s8 = scalar_lea.vmem %s763_s0, %s686_s28  ;;  %v696_v18 = vshrl.u32 %v259_v17, 7 }
  0x17   : > { %v228_v0 = vld [vmem:[%s222_s5] sm:$0xff]  ;;  %s226_s29 = scalar_lea.vmem %s765_s2, %s686_s28  ;;  %s212_s28 = sand.u32 1, %s592_s16  }
  0x18   : > { %534 = vrcp.f32 %v228_v0  ;;  %v227_v4 = vld [vmem:[%s218_s8] sm:$0xff]  ;;  %v271_v19 = vsub.s32 1, %v696_v18  ;;  %v261_v20 = vsub.s32 0, %v696_v18  ;;  %v281_v23 = vsub.s32 2, %v696_v18  ;;  %s474_s30 = sshll.u32 %s212_s28, 3  ;;  %s479_s5 = sshll.u32 %s657_s19, 7 }
  0x19   : > { %v292_v27 = vsub.s32 3, %v696_v18  ;;  %v303_v30 = vsub.s32 4, %v696_v18  ;;  %v314_v38 = vsub.s32 5, %v696_v18  ;;  %v320_v45 = vsub.s32 6, %v696_v18  ;;  %s214_s6 = scalar_lea.vmem [#allocation2], %s474_s30  ;;  %s546_s19 = scalar_lea.vmem %s545_s14, 256 }
  0x1a   : > { %v272_v22 = vrot.slane %v230_v21, %v271_v19  ;;  %v262_v24 = vrot.slane %v230_v21, %v261_v20  ;;  %v282_v29 = vrot.slane %v230_v21, %v281_v23  ;;  %v340_v61 = vsub.s32 7, %v696_v18  ;;  %s387_s7 = sshll.u32 %s214_s6, 4  ;;  %s388_s7 = int_to_ptr.vmem [resolvable:$true] %s387_s7 }
  0x1b   : > { %v293_v32 = vrot.slane %v230_v21, %v292_v27  ;;  %v304_v37 = vrot.slane %v230_v21, %v303_v30  ;;  %v315_v44 = vrot.slane %v230_v21, %v314_v38  ;;  %v321_v49 = vrot.slane %v230_v21, %v320_v45  ;;  %p547_p0 = scmp.lt.s32.totalorder %s388_s7, %s545_s14 }
  0x1c   : > { %v341_v63 = vrot.slane %v230_v21, %v340_v61  ;;  %v346_v2 = vrot.slane %v231_v62, %v261_v20  ;;  %v370_v20 = vrot.slane %v231_v62, %v281_v23 }
  0x25   : > { %v535_v3 = vpop.eup %534 }
  0x26   : > { %243 = vrot.lane.b32.xlu1 %v535_v3, %s604_s9  ;;  %235 = vrot.lane.b32.xlu0 %v535_v3, %s605_s10  ;;  %s385_s10 = scalar_lea.hbm %s767_s4, %s479_s5 }
  0x2a   : > { %239 = vrot.lane.b32.xlu0 %v535_v3, %s606_s11  ;;  %248 = vrot.lane.b32.xlu1 %v227_v4, %s607_s12  ;;  %s374_s11 = scalar_lea.sflag [#allocation3], %s212_s28  ;;  %s540_s12 = scalar_lea.vmem %s388_s7, 128 }
  0x2b   : > { %p541_p11 = scmp.ne.s32.totalorder %s388_s7, %s540_s12  ;;  %p548_p1 = scmp.lt.s32.totalorder %s546_s19, %s540_s12 }
  0x2d   : > { %p542_p12 = pnand %p541_p11, %p674_p5  ;;  %p549_p2 = por %p548_p1, %p547_p0 }
  0x2f   : > { %p543_p13 = pneg %p542_p12 }
  0x31   : > { %p550_p3 = pnand %p549_p2, %p543_p13 }
  0x98   : > { %v236_v5 = vpop.permute.xlu0 %235  ;;  %v244_v6 = vpop.permute.xlu1 %243 }
  0x99   : > { %v238_v7 = vmul.f32 %v236_v5, %v227_v4  ;;  %v246_v8 = vmul.f32 %v244_v6, %v227_v4 }
  0x9b   : > { %256 = vperm.xlu0 %529, %v238_v7  }
  0x9c   : > { %v240_v9 = vpop.permute.xlu0 %239  ;;  %v249_v11 = vpop.permute.xlu1 %248 }
  0x9d   : > { %v242_v10 = vmul.f32 %v240_v9, %v227_v4  ;;  %v251_v13 = vsub.f32 %v227_v4, %v249_v11  ;;  %v229_v4 = vld [vmem:[%s226_s29] sm:$0xff] }
  0x9f   : > { %266 = vperm.xlu1 %530, %v242_v10   ;;  %532 = vset.pattern.permute.xlu0 %v608_v12  ;;  %v252_v15 = vmul.f32 %v251_v13, %v240_v9  ;;  %v253_v16 = vmul.f32 %v251_v13, %v244_v6 }
  0xa0   : > { %287 = vperm.xlu0 %532, %v246_v8  }
  0xa3   : > { %531 = vset.pattern.permute.xlu1 %v609_v14 }
  0xa4   : > { %276 = vperm.xlu1 %531, %v242_v10  }
  0xa8   : > { %298 = vperm.xlu1 %531, %v252_v15  }
  0xac   : > { %533 = vset.pattern.permute.xlu1 %v608_v12 }
  0xad   : > { %309 = vperm.xlu1 %533, %v253_v16   ;;  %v365_v16 = vrot.slane %v231_v62, %v271_v19 }
 0x116   : > { %v257_v26 = vpop.permute.xlu0 %256 }
 0x117   : > { %v263_v31 = vmul.f32 %v262_v24, %v257_v26 }
 0x11a   : > { %v267_v25 = vpop.permute.xlu1 %266 }
 0x11b   : > { %v273_v28 = vmul.f32 %v272_v22, %v267_v25  ;;  %v288_v35 = vpop.permute.xlu0 %287 }
 0x11c   : > { %v294_v40 = vmul.f32 %v293_v32, %v288_v35 }
 0x11d   : > { %v274_v34 = vadd.f32 %v273_v28, %v263_v31 }
 0x11f   : > { %v277_v33 = vpop.permute.xlu1 %276 }
 0x120   : > { %v283_v36 = vmul.f32 %v282_v29, %v277_v33 }
 0x122   : > { %v284_v39 = vadd.f32 %v283_v36, %v274_v34 }
 0x123   : > { %v299_v41 = vpop.permute.xlu1 %298 }
 0x124   : > { %v295_v42 = vadd.f32 %v294_v40, %v284_v39  ;;  %v305_v43 = vmul.f32 %v304_v37, %v299_v41 }
 0x126   : > { %v306_v47 = vadd.f32 %v305_v43, %v295_v42 }
 0x128   : > { %v310_v46 = vpop.permute.xlu1 %309 }
 0x129   : > { %v316_v48 = vmul.f32 %v315_v44, %v310_v46 }
 0x12b   : > { %v317_v50 = vadd.f32 %v316_v48, %v306_v47 }
 0x12d   : > { %v322_v51 = vadd.f32 %v321_v49, %v317_v50 }
 0x12f   : > { %v324_v52 = vsel %vm323_vm0, %v322_v51, 0.0 }
 0x130   : > { %325 = vadd.xlane.f32.xlu0 %v324_v52 }
 0x1b9   : > { %v326_v53 = vpop.xlane.xlu0 %325 }
 0x1ba   : > { %v328_v54 = vmul.f32 0.03125, %v326_v53 }
 0x1bc   : > { %v329_v55 = vsub.f32 %v322_v51, %v328_v54 }
 0x1be   : > { %v330_v56 = vmul.f32 %v329_v55, %v329_v55 }
 0x1c0   : > { %v331_v57 = vsel %vm323_vm0, %v330_v56, 0.0 }
 0x1c1   : > { %332 = vadd.xlane.f32.xlu1 %v331_v57 }
 0x24a   : > { %v333_v58 = vpop.xlane.xlu1 %332 }
 0x24b   : > { %v334_v59 = vmul.f32 0.03125, %v333_v58 }
 0x24d   : > { %v335_v60 = vadd.f32 1e-05, %v334_v59 }
 0x24f   : > { %536 = vrsqrt.f32 %v335_v60 }
 0x25c   : > { %v537_v0 = vpop.eup %536 }
 0x25d   : > { %v337_v1 = vmul.f32 %v537_v0, %v329_v55 }
 0x25f   : > { %v342_v3 = vmul.f32 %v341_v63, %v337_v1 }
 0x261   : > { %v347_v5 = vadd.f32 %v346_v2, %v342_v3 }
 0x263   : > { %v348_v6 = vadd.f32 %v347_v5, %v229_v4 }
 0x265   : > { %v349_v7 = vsel %vm323_vm0, %v348_v6, 0.0 }
 0x266   : > { %350 = vadd.xlane.f32.xlu0 %v349_v7 }
 0x2ef   : > { %v351_v8 = vpop.xlane.xlu0 %350 }
 0x2f0   : > { %v352_v9 = vmul.f32 0.03125, %v351_v8 }
 0x2f2   : > { %v353_v10 = vsub.f32 %v348_v6, %v352_v9 }
 0x2f4   : > { %v354_v11 = vmul.f32 %v353_v10, %v353_v10 }
 0x2f6   : > { %v355_v12 = vsel %vm323_vm0, %v354_v11, 0.0 }
 0x2f7   : > { %356 = vadd.xlane.f32.xlu0 %v355_v12 }
 0x380   : > { %v357_v13 = vpop.xlane.xlu0 %356 }
 0x381   : > { %v358_v14 = vmul.f32 0.03125, %v357_v13 }
 0x383   : > { %v359_v15 = vadd.f32 1e-05, %v358_v14 }
 0x385   : > { %538 = vrsqrt.f32 %v359_v15 }
 0x392   : > { %v539_v17 = vpop.eup %538 }
 0x393   : > { %v361_v21 = vmul.f32 %v539_v17, %v353_v10 }
 0x395   : > { %v366_v22 = vmul.f32 %v365_v16, %v361_v21 }
 0x397   : > { %v371_v24 = vadd.f32 %v370_v20, %v366_v22 }
 0x399   : > { %372 = vst.msk [vmem:[%s214_s6] sm:$0xff] %vm323_vm0, %v371_v24 }
 0x39a   : > { %553 = shalt.err (!%p550_p3)
}
 0x39b   : > { %s554_s20 = scalar_lea.hbm %s385_s10, 128  ;;  %s558_s27 = scalar_lea.hbm %s767_s4, 256 }
 0x39c   : > { %p555_p4 = scmp.ne.s32.totalorder %s385_s10, %s554_s20  ;;  %p559_p9 = scmp.lt.s32.totalorder %s385_s10, %s767_s4 }
 0x39d   : > { %p560_p10 = scmp.lt.s32.totalorder %s558_s27, %s554_s20 }
 0x39e   : > { %p556_p7 = pnand %p555_p4, %p674_p5 }
 0x39f   : > { %p561_p11 = por %p560_p10, %p559_p9 }
 0x3a0   : > { %p557_p8 = pneg %p556_p7 }
 0x3a2   : > { %p562_p12 = pnand %p561_p11, %p557_p8 }
 0x3a4   : > { %565 = shalt.err (!%p562_p12)
}
 0x3a5   : > { %482 = dma.vmem_to_hbm [thread:$0]  (%p674_p5), %s388_s7, 128, %s385_s10, %s374_s11  }
 0x3a6 PF: > { %p488_p13 = scmp.ge.s32.totalorder %s600_s18, 2  ;;  %s399_s30 = sand.u32 1, %s588_s15  }
 0x3a7   : > { %s400_s5 = scalar_lea.sflag [#allocation3], %s399_s30 }
 0x3a8   : > { %p485_p0 = pnand %p488_p13, %p678_p6 }
 0x3aa   : > { %p486_p1 = pneg %p485_p0 }
 0x3ac   : > { %583 = dma.done.wait (%p486_p1), %s400_s5, 128  }
 0x3ad   : > { %585 = vsyncadd (%p486_p1), %s400_s5, 4294967168  ;;  %p14_p2 = scmp.ge.s32.totalorder %s661_s21, 4   ;;  %s770_s15 = smov %s592_s16 }
 0x3ae   : > { %s771_s16 = smov %s596_s17  ;;  %s772_s17 = smov %s672_s24 }
 0x3af   : > { %s773_s18 = smov %s661_s21  ;;  %16 = sbr.rel (!%p14_p2) target bundleno = 3 (0x3), region = 77 }
 0x3b4   :  { %405 = vsyncpa [#allocation3], 1 }
 0x3b5   :  { %407 = vsyncpa [#allocation3 + $0x1], 1 }

</bundles_post_ra>
